<compile_context>
chip_gen: v6e
topology: v6e:2x2x1
jax: 0.10.0
libtpu: 0.0.40
codegen_flags: <defaults>
</compile_context>

<pallas_src>
import jax
import jax.numpy as jnp
from jax import lax
from jax.experimental import pallas as pl
from jax.experimental.pallas import tpu as pltpu


def _round_up(x, m):
    return ((x + m - 1) // m) * m


# ---------------------------------------------------------------------------
# Kernels
# ---------------------------------------------------------------------------

def _pooler_kernel_fused(x_ref, w_ref, b_ref, o_ref):
    # Fast path: tk == D (no reduction grid axis), no accumulator scratch.
    # x_ref: (tb, D)   first-token activations
    # w_ref: (tn, D)   weight tile, native PyTorch (out, in) layout
    # b_ref: (1, tn)   bias tile
    # o_ref: (tb, tn)  pooled output tile
    y = lax.dot_general(
        x_ref[...], w_ref[...],
        dimension_numbers=(((1,), (1,)), ((), ())),   # x @ W.T, no transpose copy
        preferred_element_type=jnp.float32)
    y = y + b_ref[...].astype(jnp.float32)
    o_ref[...] = jnp.tanh(y).astype(o_ref.dtype)


def _pooler_kernel_acc(x_ref, w_ref, b_ref, o_ref, acc_ref):
    # Fallback path for very large D: K is tiled, f32 accumulator persists
    # across the innermost ("arbitrary") grid axis.
    k = pl.program_id(2)

    @pl.when(k == 0)
    def _init():
        acc_ref[...] = jnp.zeros_like(acc_ref)

    acc_ref[...] += lax.dot_general(
        x_ref[...], w_ref[...],
        dimension_numbers=(((1,), (1,)), ((), ())),
        preferred_element_type=jnp.float32)

    @pl.when(k == pl.num_programs(2) - 1)
    def _finalize():
        y = acc_ref[...] + b_ref[...].astype(jnp.float32)
        o_ref[...] = jnp.tanh(y).astype(o_ref.dtype)


# ---------------------------------------------------------------------------
# Wrapper
# ---------------------------------------------------------------------------

def _vmem_budget_bytes():
    """Generation-aware VMEM budget (leave headroom under the physical size)."""
    try:
        phys = pltpu.get_tpu_info().vmem_capacity_bytes
    except Exception:
        phys = 64 * 1024 * 1024          # conservative: v7x physical VMEM
    return int(min(phys * 3 // 4, 100 * 1024 * 1024))


def t5_pooler(hidden_states, weight, bias):
    """T5Pooler forward.

    hidden_states: (B, S, D); weight: (D_out, D_in) = (D, D) PyTorch layout;
    bias: (D,).  Returns (B, D) = tanh(hidden_states[:, 0] @ W.T + b).
    """
    B, S, D = hidden_states.shape
    assert weight.shape == (D, D) and bias.shape == (D,)

    out_dtype = hidden_states.dtype
    x_bytes = jnp.dtype(hidden_states.dtype).itemsize
    w_bytes = jnp.dtype(weight.dtype).itemsize
    b_bytes = jnp.dtype(bias.dtype).itemsize

    # Sublane-packing multiple for the activation dtype (8 f32 / 16 bf16 / 32 i8)
    sublane = max(8, 32 // max(x_bytes, 1))

    # First-token gather (wrapper side; see header comment).
    first = hidden_states[:, 0, :]                         # (B, D)
    # TODO(synk): fusing this gather into the kernel needs a size-1 block on
    # the sequence (second-to-last layout) axis, which the (8,128) rule makes
    # fragile; kept in the wrapper since it is ~B*D bytes vs D*D weight bytes.

    # Single batch tile so the weight is streamed from HBM exactly once.
    tb = min(_round_up(B, sublane), 1024)
    b_pad = _round_up(B, tb)
    if b_pad != B:
        first = jnp.pad(first, ((0, b_pad - B), (0, 0)))

    budget = _vmem_budget_bytes()

    def working_set(tb_, tn_, tk_, with_acc):
        ws = (2 * tn_ * tk_ * w_bytes        # double-buffered weight tile
              + 2 * tb_ * tk_ * x_bytes      # double-buffered x tile
              + 2 * tb_ * tn_ * x_bytes      # double-buffered out tile
              + 2 * tn_ * b_bytes)           # bias tile
        if with_acc:
            ws += tb_ * tn_ * 4              # f32 accumulator scratch
        return ws

    # Feature-dim handling: aligned D tiles are multiples of 128; a
    # non-aligned D is used as a full tile when it fits, otherwise padded
    # once to a lane multiple so it can be tiled (graceful, no OOM/lowering
    # failure).
    d_work = D
    pad_d = 0
    if D % 128 == 0:
        cands = [t for t in range(D, 127, -128) if D % t == 0]
    else:
        if working_set(tb, D, D, False) <= budget:
            cands = [D]
        else:
            d_work = _round_up(D, 128)
            pad_d = d_work - D
            cands = [t for t in range(d_work, 127, -128) if d_work % t == 0]

    if pad_d:
        first = jnp.pad(first, ((0, 0), (0, pad_d)))
        weight = jnp.pad(weight, ((0, pad_d), (0, pad_d)))
        bias = jnp.pad(bias, ((0, pad_d),))

    # Tile search: prefer tk = full D (contiguous weight-row DMAs, no
    # reduction axis), then the largest out-feature tile tn that fits.
    tn = tk = None
    for tk_c in cands:
        with_acc = (tk_c != d_work)
        for tn_c in cands:
            if working_set(tb, tn_c, tk_c, with_acc) <= budget:
                tn, tk = tn_c, tk_c
                break
        if tn is not None:
            break
    if tn is None:                    # pathological: smallest tiles
        tn = tk = cands[-1]

    nk = d_work // tk
    bias2d = bias.reshape(1, d_work)

    # Advisory cost hint so XLA can overlap this bandwidth-bound call.
    cost = pl.CostEstimate(
        flops=2 * b_pad * d_work * d_work,
        transcendentals=b_pad * d_work,
        bytes_accessed=((b_pad // tb) * d_work * d_work * w_bytes
                        + 2 * b_pad * d_work * x_bytes
                        + d_work * b_bytes))

    # Batch axis "arbitrary", out-feature axis "parallel": on v7x the
    # 2-TensorCore split lands on N so the weight is not read twice.
    dim_sems = (("arbitrary", "parallel") if nk == 1
                else ("arbitrary", "parallel", "arbitrary"))

    common = dict(
        out_shape=jax.ShapeDtypeStruct((b_pad, d_work), out_dtype),
        compiler_params=pltpu.CompilerParams(
            dimension_semantics=dim_sems,
            vmem_limit_bytes=budget),
        cost_estimate=cost)

    if nk == 1:
        out = pl.pallas_call(
            _pooler_kernel_fused,
            grid_spec=pltpu.PrefetchScalarGridSpec(
                num_scalar_prefetch=0,
                grid=(b_pad // tb, d_work // tn),
                in_specs=[
                    pl.BlockSpec((tb, tk), lambda i, j: (i, 0)),   # x
                    pl.BlockSpec((tn, tk), lambda i, j: (j, 0)),   # W (out, in)
                    pl.BlockSpec((1, tn), lambda i, j: (0, j)),    # bias
                ],
                out_specs=pl.BlockSpec((tb, tn), lambda i, j: (i, j)),
            ),
            **common,
        )(first, weight, bias2d)
    else:
        out = pl.pallas_call(
            _pooler_kernel_acc,
            grid_spec=pltpu.PrefetchScalarGridSpec(
                num_scalar_prefetch=0,
                grid=(b_pad // tb, d_work // tn, nk),
                in_specs=[
                    pl.BlockSpec((tb, tk), lambda i, j, k: (i, k)),   # x
                    pl.BlockSpec((tn, tk), lambda i, j, k: (j, k)),   # W (out, in)
                    pl.BlockSpec((1, tn), lambda i, j, k: (0, j)),    # bias
                ],
                out_specs=pl.BlockSpec((tb, tn), lambda i, j, k: (i, j)),
                scratch_shapes=[pltpu.VMEM((tb, tn), jnp.float32)],
            ),
            **common,
        )(first, weight, bias2d)

    return out[:B, :D]


def t5_pooler_reference(hidden_states, weight, bias):
    first = hidden_states[:, 0, :]
    return jnp.tanh(first @ weight.T + bias)


if __name__ == "__main__":
    # Small synthetic config: batch=2, seq=8, d_model=32
    B, S, D = 2, 8, 32

    key = jax.random.PRNGKey(0)
    k_x, k_w, k_b = jax.random.split(key, 3)

    hidden_states = jax.random.normal(k_x, (B, S, D), dtype=jnp.float32)
    # Deterministic in-script parameter init (nn.Linear(d_model, d_model) shapes)
    weight = jax.random.normal(k_w, (D, D), dtype=jnp.float32) * 0.05   # (out, in)
    bias = jax.random.normal(k_b, (D,), dtype=jnp.float32) * 0.05

    out = t5_pooler(hidden_states, weight, bias)
    out = jax.block_until_ready(out)

    ref = t5_pooler_reference(hidden_states, weight, bias)
    assert out.shape == (B, D)
    assert jnp.allclose(out, ref, atol=1e-5, rtol=1e-5), "mismatch vs reference"

    print("KERNEL_OK")
</pallas_src>

<mosaic_0001>
module attributes {stable_mosaic.version = 11 : i64} {
  func.func @_pooler_kernel_fused(%arg0: i32, %arg1: i32, %arg2: memref<8x32xf32, #tpu.memory_space<vmem>>, %arg3: memref<32x32xf32, #tpu.memory_space<vmem>>, %arg4: memref<1x32xf32, #tpu.memory_space<vmem>>, %arg5: memref<8x32xf32, #tpu.memory_space<vmem>>) attributes {dimension_semantics = [#tpu.dimension_semantics<arbitrary>, #tpu.dimension_semantics<parallel>], iteration_bounds = array<i64: 1, 1>, scalar_prefetch = 0 : i64, scratch_operands = 0 : i64, tpu.core_type = #tpu.core_type<tc>, window_params = [{transform_indices = @transform_0, window_bounds = array<i64: 8, 32>}, {transform_indices = @transform_1, window_bounds = array<i64: 32, 32>}, {transform_indices = @transform_2, window_bounds = array<i64: 1, 32>}, {transform_indices = @transform_3, window_bounds = array<i64: 8, 32>}]} {
    %c0 = arith.constant 0 : index
    %c0_0 = arith.constant 0 : index
    %0 = vector.load %arg2[%c0, %c0_0] : memref<8x32xf32, #tpu.memory_space<vmem>>, vector<8x32xf32>
    %c0_1 = arith.constant 0 : index
    %c0_2 = arith.constant 0 : index
    %1 = vector.load %arg3[%c0_1, %c0_2] : memref<32x32xf32, #tpu.memory_space<vmem>>, vector<32x32xf32>
    %cst = arith.constant dense<0.000000e+00> : vector<8x32xf32>
    %2 = tpu.matmul %0, %1, %cst {dimension_numbers = #tpu.dot_dimension_numbers<[1], [1], [0], [0], [0, 0, 1, 0], [], []>} : vector<8x32xf32>, vector<32x32xf32>, vector<8x32xf32> -> vector<8x32xf32>
    %c0_3 = arith.constant 0 : index
    %c0_4 = arith.constant 0 : index
    %3 = vector.load %arg4[%c0_3, %c0_4] : memref<1x32xf32, #tpu.memory_space<vmem>>, vector<1x32xf32>
    %4 = vector.broadcast %3 : vector<1x32xf32> to vector<8x32xf32>
    %5 = arith.addf %2, %4 : vector<8x32xf32>
    %6 = math.tanh %5 : vector<8x32xf32>
    %c0_5 = arith.constant 0 : index
    %c0_6 = arith.constant 0 : index
    %7 = vector.load %arg5[%c0_5, %c0_6] : memref<8x32xf32, #tpu.memory_space<vmem>>, vector<8x32xf32>
    tpu.vector_store %arg5[%c0_5, %c0_6], %6 {strides = array<i32>} : memref<8x32xf32, #tpu.memory_space<vmem>>, vector<8x32xf32>,
    return
  }
  func.func @transform_0(%arg0: i32, %arg1: i32) -> (i32, i32) {
    %c0_i32 = arith.constant 0 : i32
    %c0_i32_0 = arith.constant 0 : i32
    return %arg0, %c0_i32 : i32, i32
  }
  func.func @transform_1(%arg0: i32, %arg1: i32) -> (i32, i32) {
    %c0_i32 = arith.constant 0 : i32
    %c0_i32_0 = arith.constant 0 : i32
    return %arg1, %c0_i32 : i32, i32
  }
  func.func @transform_2(%arg0: i32, %arg1: i32) -> (i32, i32) {
    %c0_i32 = arith.constant 0 : i32
    %c0_i32_0 = arith.constant 0 : i32
    return %c0_i32, %arg1 : i32, i32
  }
  func.func @transform_3(%arg0: i32, %arg1: i32) -> (i32, i32) {
    %c0_i32 = arith.constant 0 : i32
    return %arg0, %arg1 : i32, i32
  }
}

</mosaic_0001>

<bundles_post_ra>
// kernel: tpu_custom_call.1
= control target key start
LH: loop header
LB: loop body
LE: loop exit
PB: predicated region body
PF: predicated region fallthrough
CT: control target
= control target key end

     0   :  { %8 = vsyncpa [#allocation3], 0  ;;  %s299_s0 = inlined_call_operand.hbm [shape: f32[8,32], index: 0, kind: input, shape index: {}]   ;;  %s300_s1 = inlined_call_operand.hbm [shape: f32[32,32], index: 1, kind: input, shape index: {}]   ;;  %s301_s2 = inlined_call_operand.vmem [shape: f32[1,32], index: 2, kind: input, shape index: {}]   ;;  %s302_s3 = inlined_call_operand.hbm [shape: f32[8,32], index: 3, kind: output, shape index: {}]  }
   0x1   :  { %9 = vsyncpa [#allocation6], 0 }
   0x2   :  { %10 = vsyncpa [#allocation4], 0  ;;  %s254_s12 = smov [#allocation2]   ;;  %s255_s14 = smov [#allocation5]  }
   0x3   :  { %s17_s13 = sshll.u32 %s254_s12, 4  ;;  %s26_s15 = sshll.u32 %s255_s14, 4  ;;  %s18_s13 = int_to_ptr.vmem [resolvable:$true] %s17_s13  ;;  %s27_s15 = int_to_ptr.vmem [resolvable:$true] %s26_s15 }
   0x4   :  { %s196_s16 = scalar_lea.vmem %s18_s13, 128  ;;  %p201_p1 = scmp.lt.s32.totalorder %s18_s13, %s18_s13 }
   0x5   :  { %p197_p0 = scmp.ne.s32.totalorder %s18_s13, %s196_s16  ;;  %p202_p2 = scmp.lt.s32.totalorder %s196_s16, %s196_s16 }
   0x7   :  { %p203_p3 = por %p202_p2, %p201_p1 }
   0x9   :  { %p204_p4 = pnand %p203_p3, %p197_p0 }
   0xb   :  { %207 = shalt.err (!%p204_p4)
}
   0xc   :  { %20 = dma.hbm_to_vmem [thread:$0]  %s299_s0, 128, %s18_s13, [#allocation3]  }
   0xd   :  { %s216_s19 = scalar_lea.vmem %s27_s15, 512  ;;  %p221_p6 = scmp.lt.s32.totalorder %s27_s15, %s27_s15 }
   0xe   :  { %p217_p5 = scmp.ne.s32.totalorder %s27_s15, %s216_s19  ;;  %p222_p7 = scmp.lt.s32.totalorder %s216_s19, %s216_s19 }
  0x10   :  { %p223_p8 = por %p222_p7, %p221_p6 }
  0x12   :  { %p224_p9 = pnand %p223_p8, %p217_p5 }
  0x14   :  { %227 = shalt.err (!%p224_p9)
}
  0x15   :  { %s256_s20 = smov 128   ;;  %s257_s21 = smov 8  }
  0x16   :  { %32 = dma.hbm_to_vmem [thread:$0]  %s300_s1, 512, %s27_s15, [#allocation6], %s256_s20, %s256_s20, %s257_s21  }
  0x17   :  { %248 = dma.done.wait [#allocation3], 128  }
  0x18   :  { %249 = vsyncadd [#allocation3], 4294967168 }
  0x19   :  { %250 = dma.done.wait [#allocation6], 512  }
  0x1a   :  { %251 = vsyncadd [#allocation6], 4294966784  ;;  %v258_v0 = vmov 0.0   ;;  %vm259_vm0 = vmmov 0   ;;  %vm53_vm1 = vcmask 261120   ;;  %v45_v1 = vld [vmem:[#allocation5 + $0x18] sm:$0xff] }
  0x1b   :  { %168 = vmatprep.subr.mxu0 %v258_v0  ;;  %176 = vmatprep.mubr.msk.f32.mxu0 %vm259_vm0, %v258_v0  ;;  %v44_v2 = vld [vmem:[#allocation5 + $0x10] sm:$0xff]  ;;  %v43_v3 = vld [vmem:[#allocation5 + $0x8] sm:$0xff]  ;;  %v42_v4 = vld [vmem:[#allocation5] sm:$0xff]  ;;  %s260_s24 = smov [#allocation7]  }
  0x1c   :  { %169 = vmatpush3.xpose.msk.msra.mxu0 %vm53_vm1, %v45_v1  ;;  %v41_v5 = vld [vmem:[#allocation2] sm:$0xff]  ;;  %s147_s25 = sshll.u32 %s260_s24, 4  ;;  %s148_s25 = int_to_ptr.vmem [resolvable:$true] %s147_s25 }
  0x1d   :  { %170 = vmatprep.subr.mxu0 %v258_v0  ;;  %v157_v6 = vld [vmem:[%s301_s2] ss:$0 sm:$0xff]  ;;  %s228_s26 = scalar_lea.vmem %s148_s25, 128  ;;  %p233_p11 = scmp.lt.s32.totalorder %s148_s25, %s148_s25 }
  0x1e   :  { %p229_p10 = scmp.ne.s32.totalorder %s148_s25, %s228_s26  ;;  %p234_p12 = scmp.lt.s32.totalorder %s228_s26, %s228_s26 }
  0x20   :  { %171 = vmatpush3.xpose.msk.msra.mxu0 %vm53_vm1, %v44_v2  ;;  %p235_p13 = por %p234_p12, %p233_p11 }
  0x21   :  { %172 = vmatprep.subr.mxu0 %v258_v0 }
  0x22   :  { %p236_p0 = pnand %p235_p13, %p229_p10 }
  0x24   :  { %173 = vmatpush3.xpose.msk.msra.mxu0 %vm53_vm1, %v43_v3 }
  0x25   :  { %174 = vmatprep.subr.mxu0 %v258_v0 }
  0x28   :  { %175 = vmatpush3.xpose.msk.msra.mxu0 %vm53_vm1, %v42_v4 }
  0x2b   :  { %177 = vmatmul.mubr.msk.f32.vlgmr.msra.gmra.mxu0 %vm53_vm1, %v41_v5 }
  0xeb   :  { %v135_v7 = vpop.f32.mrf.mxu0 }
  0xec   :  { %v136_v8 = vadd.f32 %v157_v6, %v135_v7 }
  0xed   :  { %v178_v9 = vpop.f32.mrf.mxu0 }
  0xee   :  { %186 = vtanh.f32 %v136_v8 }
  0xfb   :  { %v187_v10 = vpop.eup %186 }
  0xfc   :  { %140 = vst.msk [vmem:[#allocation7] sm:$0xff] %vm53_vm1, %v187_v10 }
  0xfd   :  { %239 = shalt.err (!%p236_p0)
}
  0xfe   :  { %150 = dma.vmem_to_hbm [thread:$0]  %s148_s25, 128, %s302_s3, [#allocation4]  }
  0xff   :  { %252 = dma.done.wait [#allocation4], 128  }
 0x100   :  { %253 = vsyncadd [#allocation4], 4294967168 }
 0x101   :  { %154 = vsyncpa [#allocation3], 1 }
 0x102   :  { %155 = vsyncpa [#allocation6], 1 }
 0x103   :  { %156 = vsyncpa [#allocation4], 1 }

</bundles_post_ra>
